<compile_context>
chip_gen: v7x
topology: tpu7x:2x2x1
jax: 0.10.0
libtpu: 0.0.40
codegen_flags: <defaults>
</compile_context>

<pallas_src>
import functools

import numpy as np
import jax
import jax.numpy as jnp
from jax import lax
from jax.experimental import pallas as pl
from jax.experimental.pallas import tpu as pltpu

ML = 2.9086   # hard-coded constants from the PyTorch forward
SL = 1.898

# Packed output column layout (lane index in the (B, 128) output):
#   0:h_n  1:c_n  2:l_n  3:bp_n  4:Gate_ib  5:Gate_oo  6:Gate_ol  7:Gate_f  8:obs_std
_PACK_W = 128


def _mcpbrnn_kernel(seq_len, time_lag, batch_size,
                    # inputs
                    s_ref,      # SMEM (B, S): 1 - oo1h - ol[b,t]   (f = s - oo1h*tanh)
                    u1_ref,     # SMEM (B, S): x[t, b, 0]
                    c_ref,      # SMEM (4,):   [A2, C2, oo1h, obs_std]
                    # outputs
                    out_ref):   # VMEM (B, 128) packed results
    # Rows b < time_lag must stay zero; single vectorized init.
    out_ref[...] = jnp.zeros_like(out_ref)

    # Hoist scalar->vector broadcasts out of the loops (JAX does not CSE them).
    A2 = jnp.full((1, _PACK_W), c_ref[0], jnp.float32)
    C2 = jnp.full((1, _PACK_W), c_ref[1], jnp.float32)
    oo1h = jnp.full((1, _PACK_W), c_ref[2], jnp.float32)
    lane = lax.broadcasted_iota(jnp.int32, (1, _PACK_W), 1)
    # obs_std pre-placed in lane 8; lanes 3 (bp_n) and 4 (Gate_ib) stay 0.
    base_row = jnp.where(lane == 8, c_ref[3], 0.0).astype(jnp.float32)

    t_last = seq_len - 1
    inner_unroll = max(1, min(8, t_last))

    def outer_body(b, c0):
        # t in [0, seq_len-1): only the state update survives from these steps
        # in the reference loop.  Critical path per step:
        #   c -> mul(A2) -> add(C2) -> tanh -> mul(oc) -> sub -> c'
        # with (s*c + u1) and (oo1h*c) computed off the tanh path.
        def inner_body(t, c0):
            sc = s_ref[b, t] * c0 + u1_ref[b, t]     # off the tanh path
            oc = oo1h * c0                           # off the tanh path
            tt = jnp.tanh(c0 * A2 + C2)
            return sc - oc * tt                      # c_1 = f*c_0 + u1 (ib == 0)

        c0 = lax.fori_loop(0, t_last, inner_body, c0, unroll=inner_unroll)

        # Last time step (t = seq_len-1): the only step whose outputs survive.
        tt = jnp.tanh(c0 * A2 + C2)
        oo = oo1h * tt + oo1h                        # oo1 * sigmoid(...)
        f = s_ref[b, t_last] - oo1h * tt             # 1 - oo - ol
        ol = (1.0 - oo) - f                          # recover Gate_ol
        h0 = oo * c0                                 # h_n = h_0 + bp_0 (bp_0 == 0)
        l0 = ol * c0

        row = base_row
        row = jnp.where(lane == 0, h0, row)
        row = jnp.where(lane == 1, c0, row)
        row = jnp.where(lane == 2, l0, row)
        row = jnp.where(lane == 5, oo, row)
        row = jnp.where(lane == 6, ol, row)
        row = jnp.where(lane == 7, f, row)
        out_ref[pl.ds(b, 1), :] = row                # one 128-lane store per b

        return f * c0 + u1_ref[b, t_last]            # carry state into next b

    # Cell state is carried across both t AND b (matches the PyTorch loop).
    lax.fori_loop(time_lag, batch_size, outer_body,
                  jnp.zeros((1, _PACK_W), jnp.float32))


def mcpbrnn_generic_scaling_forward(x, y_obs, cmean, cstd, params, *,
                                    time_lag, spin_len, traintime_len,
                                    batch_first=True):
    """Returns (h_n, c_n, l_n, bp_n, Gate_ib, Gate_oo, Gate_ol, Gate_f, h_nout, obs_std)."""
    x = jnp.asarray(x, jnp.float32)
    if batch_first:
        x = jnp.transpose(x, (1, 0, 2))                  # -> (seq, batch, input)
    seq_len, batch_size, input_size = x.shape
    assert input_size >= 2, "forward uses x[..., 0] and x[..., 1]"
    y_obs = jnp.asarray(y_obs, jnp.float32).reshape(batch_size, -1)[:, :1]

    scal = lambda v: jnp.asarray(v, jnp.float32).reshape(-1)[0]
    w_yom, w_ylm, w_yfm = (scal(params["weight_r_yom"]),
                           scal(params["weight_r_ylm"]),
                           scal(params["weight_r_yfm"]))
    b0_yom, wb1 = scal(params["bias_b0_yom"]), scal(params["weight_b1_yom"])
    b0_ylm, wb2 = scal(params["bias_b0_ylm"]), scal(params["weight_b2_ylm"])
    mo, so = scal(cmean), scal(cstd)

    # Softmax-style gate prefactors (constant over the whole sequence).
    e_o, e_l, e_f = jnp.exp(w_yom), jnp.exp(w_ylm), jnp.exp(w_yfm)
    den = e_o + e_l + e_f
    oo1 = e_o / den
    ol1 = e_l / den
    oo1h = 0.5 * oo1                                     # oo = oo1h*tanh(A2*c+C2)+oo1h
    A2 = 0.5 * wb1 / so
    C2 = 0.5 * (b0_yom - mo * wb1 / so)

    # Vectorized precompute of the input-only gate (no dependence on the carried
    # cell state) and of u1, in (batch, seq) layout (long axis last for SMEM).
    u1_all = jnp.transpose(x[:, :, 0], (1, 0))           # (B, S)
    u2_all = jnp.transpose(x[:, :, 1], (1, 0))           # (B, S)
    ol_all = ol1 * jax.nn.sigmoid(b0_ylm + ((u2_all - ML) / SL) * wb2)
    s_all = (1.0 - oo1h) - ol_all                        # f = s - oo1h*tanh(...)

    # obs_std = torch.std(y_obs[spinLen:traintimeLen]) (unbiased, ddof=1).
    # TODO(synk): no guard for traintime_len - spin_len < 2 (NaN), same as torch.
    obsstd = jnp.std(y_obs[spin_len:traintime_len, 0], ddof=1)

    consts = jnp.stack([A2, C2, oo1h, obsstd]).astype(jnp.float32)   # (4,)

    B = batch_size
    n_steps = max(0, (B - int(time_lag))) * seq_len
    cost = pl.CostEstimate(
        flops=8 * n_steps,
        transcendentals=n_steps,
        bytes_accessed=int(4 * (2 * B * seq_len + 4 + B * _PACK_W)),
    )

    kernel = functools.partial(_mcpbrnn_kernel, seq_len, int(time_lag), B)
    smem = pl.BlockSpec(memory_space=pltpu.MemorySpace.SMEM)
    vmem = pl.BlockSpec(memory_space=pltpu.MemorySpace.VMEM)

    packed = pl.pallas_call(
        kernel,
        out_shape=jax.ShapeDtypeStruct((B, _PACK_W), jnp.float32),
        in_specs=[smem, smem, smem],
        out_specs=vmem,
        cost_estimate=cost,
    )(s_all, u1_all, consts)

    h_n = packed[:, 0:1]
    c_n = packed[:, 1:2]
    l_n = packed[:, 2:3]
    bp_n = packed[:, 3:4]
    g_ib = packed[:, 4:5]
    g_oo = packed[:, 5:6]
    g_ol = packed[:, 6:7]
    g_f = packed[:, 7:8]
    obs = packed[:, 8:9]
    h_nout = jnp.concatenate([h_n, obs], axis=1)
    return h_n, c_n, l_n, bp_n, g_ib, g_oo, g_ol, g_f, h_nout, obs


# --------------------------- numpy reference ---------------------------------
def _reference_numpy(x, y_obs, cmean, cstd, params, time_lag, spin_len, traintime_len):
    x = np.asarray(x, np.float64)
    y_obs = np.asarray(y_obs, np.float64).reshape(x.shape[0], -1)[:, :1]
    xT = np.transpose(x, (1, 0, 2))            # (seq, batch, input)
    S, B, _ = xT.shape
    sig = lambda z: 1.0 / (1.0 + np.exp(-z))

    p = {k: float(np.asarray(v).reshape(-1)[0]) for k, v in params.items()}
    eo, el, ef = np.exp(p["weight_r_yom"]), np.exp(p["weight_r_ylm"]), np.exp(p["weight_r_yfm"])
    oo1 = eo / (eo + el + ef)
    ol1 = el / (eo + el + ef)
    b0o, wb1 = p["bias_b0_yom"], p["weight_b1_yom"]
    b0l, wb2 = p["bias_b0_ylm"], p["weight_b2_ylm"]
    mo, so = float(cmean), float(cstd)

    obsstd = np.std(y_obs[spin_len:traintime_len], ddof=1)

    zs = lambda: np.zeros((B, 1), np.float64)
    h_n, c_n, l_n, bp_n = zs(), zs(), zs(), zs()
    gib, goo, gol, gf, obs = zs(), zs(), zs(), zs(), zs()

    c0 = 0.0
    for b in range(time_lag, B):
        for t in range(S):
            u1, u2 = xT[t, b, 0], xT[t, b, 1]
            oo = oo1 * sig(b0o + ((c0 - mo) / so) * wb1)
            ol = ol1 * sig(b0l + ((u2 - ML) / SL) * wb2)
            f = 1.0 - oo - ol
            c1 = f * c0 + u1
            h_n[b, 0] = oo * c0
            c_n[b, 0] = c0
            l_n[b, 0] = ol * c0
            goo[b, 0] = oo
            gol[b, 0] = ol
            gf[b, 0] = f
            obs[b, 0] = obsstd
            c0 = c1
    hnout = np.concatenate([h_n, obs], axis=1)
    return (h_n, c_n, l_n, bp_n, gib, goo, gol, gf, hnout, obs)


if __name__ == "__main__":
    key = jax.random.PRNGKey(0)
    batch, seq, input_size, hidden = 6, 8, 2, 1
    time_lag, spin_len, traintime_len = 1, 1, 5

    ks = jax.random.split(key, 10)
    x = jax.random.normal(ks[0], (batch, seq, input_size), jnp.float32)
    y_obs = jax.random.normal(ks[1], (batch, 1), jnp.float32) * 0.5 + 1.0
    cmean = jnp.float32(0.37)
    cstd = jnp.float32(1.21)

    names = ["weight_r_yom", "weight_r_ylm", "weight_r_yfm", "bias_b0_yom",
             "weight_b1_yom", "bias_b0_ylm", "weight_b2_ylm"]
    params = {n: jax.random.uniform(ks[2 + i], (hidden, hidden), jnp.float32)
              for i, n in enumerate(names)}   # matches torch.rand init shapes (H,H)/(H,)

    outs = mcpbrnn_generic_scaling_forward(
        x, y_obs, cmean, cstd, params,
        time_lag=time_lag, spin_len=spin_len, traintime_len=traintime_len)
    outs = jax.block_until_ready(outs)

    ref = _reference_numpy(np.asarray(x), np.asarray(y_obs), cmean, cstd,
                           {k: np.asarray(v) for k, v in params.items()},
                           time_lag, spin_len, traintime_len)
    for got, exp in zip(outs, ref):
        np.testing.assert_allclose(np.asarray(got), exp, rtol=1e-4, atol=1e-4)

    print("KERNEL_OK")
</pallas_src>

<mosaic_0001>
module attributes {stable_mosaic.version = 11 : i64} {
  func.func @_mcpbrnn_kernel(%arg0: memref<6x8xf32, #tpu.memory_space<smem>>, %arg1: memref<6x8xf32, #tpu.memory_space<smem>>, %arg2: memref<4xf32, #tpu.memory_space<smem>>, %arg3: memref<6x128xf32, #tpu.memory_space<vmem>>) attributes {dimension_semantics = [], scalar_prefetch = 0 : i64, scratch_operands = 0 : i64, tpu.core_type = #tpu.core_type<tc>} {
    %cst = arith.constant 0.000000e+00 : f32
    %0 = vector.broadcast %cst : f32 to vector<6x128xf32>
    %c0 = arith.constant 0 : index
    %c0_0 = arith.constant 0 : index
    %1 = vector.load %arg3[%c0, %c0_0] : memref<6x128xf32, #tpu.memory_space<vmem>>, vector<6x128xf32>
    tpu.vector_store %arg3[%c0, %c0_0], %0 {strides = array<i32>} : memref<6x128xf32, #tpu.memory_space<vmem>>, vector<6x128xf32>,
    %c0_1 = arith.constant 0 : index
    %2 = memref.load %arg2[%c0_1] : memref<4xf32, #tpu.memory_space<smem>>
    %3 = vector.broadcast %2 : f32 to vector<1x128xf32>
    %c1 = arith.constant 1 : index
    %4 = memref.load %arg2[%c1] : memref<4xf32, #tpu.memory_space<smem>>
    %5 = vector.broadcast %4 : f32 to vector<1x128xf32>
    %c2 = arith.constant 2 : index
    %6 = memref.load %arg2[%c2] : memref<4xf32, #tpu.memory_space<smem>>
    %7 = vector.broadcast %6 : f32 to vector<1x128xf32>
    %8 = tpu.iota {dimensions = array<i32: 1>} : vector<1x128xi32>
    %c8_i32 = arith.constant 8 : i32
    %9 = vector.broadcast %c8_i32 : i32 to vector<1x128xi32>
    %10 = arith.cmpi eq, %8, %9 : vector<1x128xi32>
    %c3 = arith.constant 3 : index
    %11 = memref.load %arg2[%c3] : memref<4xf32, #tpu.memory_space<smem>>
    %cst_2 = arith.constant 0.000000e+00 : f32
    %12 = vector.broadcast %11 : f32 to vector<1x128xf32>
    %13 = vector.broadcast %cst_2 : f32 to vector<1x128xf32>
    %14 = arith.select %10, %12, %13 : vector<1x128xi1>, vector<1x128xf32>
    %cst_3 = arith.constant 0.000000e+00 : f32
    %15 = vector.broadcast %cst_3 : f32 to vector<1x128xf32>
    %c1_i32 = arith.constant 1 : i32
    %c5_i32 = arith.constant 5 : i32
    %16 = arith.addi %c1_i32, %c5_i32 : i32
    %c1_i32_4 = arith.constant 1 : i32
    %17 = scf.for %arg4 = %c1_i32 to %16 step %c1_i32_4 iter_args(%arg5 = %15) -> (vector<1x128xf32>)  : i32 {
      %c0_i32 = arith.constant 0 : i32
      %18 = arith.index_cast %arg4 : i32 to index
      %19 = arith.index_cast %c0_i32 : i32 to index
      %20 = memref.load %arg0[%18, %19] : memref<6x8xf32, #tpu.memory_space<smem>>
      %21 = vector.broadcast %20 : f32 to vector<1x128xf32>
      %22 = arith.mulf %21, %arg5 : vector<1x128xf32>
      %23 = arith.index_cast %arg4 : i32 to index
      %24 = arith.index_cast %c0_i32 : i32 to index
      %25 = memref.load %arg1[%23, %24] : memref<6x8xf32, #tpu.memory_space<smem>>
      %26 = vector.broadcast %25 : f32 to vector<1x128xf32>
      %27 = arith.addf %22, %26 : vector<1x128xf32>
      %28 = arith.mulf %7, %arg5 : vector<1x128xf32>
      %29 = arith.mulf %arg5, %3 : vector<1x128xf32>
      %30 = arith.addf %29, %5 : vector<1x128xf32>
      %31 = math.tanh %30 : vector<1x128xf32>
      %32 = arith.mulf %28, %31 : vector<1x128xf32>
      %33 = arith.subf %27, %32 : vector<1x128xf32>
      %c1_i32_6 = arith.constant 1 : i32
      %34 = arith.index_cast %arg4 : i32 to index
      %35 = arith.index_cast %c1_i32_6 : i32 to index
      %36 = memref.load %arg0[%34, %35] : memref<6x8xf32, #tpu.memory_space<smem>>
      %37 = vector.broadcast %36 : f32 to vector<1x128xf32>
      %38 = arith.mulf %37, %33 : vector<1x128xf32>
      %39 = arith.index_cast %arg4 : i32 to index
      %40 = arith.index_cast %c1_i32_6 : i32 to index
      %41 = memref.load %arg1[%39, %40] : memref<6x8xf32, #tpu.memory_space<smem>>
      %42 = vector.broadcast %41 : f32 to vector<1x128xf32>
      %43 = arith.addf %38, %42 : vector<1x128xf32>
      %44 = arith.mulf %7, %33 : vector<1x128xf32>
      %45 = arith.mulf %33, %3 : vector<1x128xf32>
      %46 = arith.addf %45, %5 : vector<1x128xf32>
      %47 = math.tanh %46 : vector<1x128xf32>
      %48 = arith.mulf %44, %47 : vector<1x128xf32>
      %49 = arith.subf %43, %48 : vector<1x128xf32>
      %c2_i32 = arith.constant 2 : i32
      %50 = arith.index_cast %arg4 : i32 to index
      %51 = arith.index_cast %c2_i32 : i32 to index
      %52 = memref.load %arg0[%50, %51] : memref<6x8xf32, #tpu.memory_space<smem>>
      %53 = vector.broadcast %52 : f32 to vector<1x128xf32>
      %54 = arith.mulf %53, %49 : vector<1x128xf32>
      %55 = arith.index_cast %arg4 : i32 to index
      %56 = arith.index_cast %c2_i32 : i32 to index
      %57 = memref.load %arg1[%55, %56] : memref<6x8xf32, #tpu.memory_space<smem>>
      %58 = vector.broadcast %57 : f32 to vector<1x128xf32>
      %59 = arith.addf %54, %58 : vector<1x128xf32>
      %60 = arith.mulf %7, %49 : vector<1x128xf32>
      %61 = arith.mulf %49, %3 : vector<1x128xf32>
      %62 = arith.addf %61, %5 : vector<1x128xf32>
      %63 = math.tanh %62 : vector<1x128xf32>
      %64 = arith.mulf %60, %63 : vector<1x128xf32>
      %65 = arith.subf %59, %64 : vector<1x128xf32>
      %c3_i32 = arith.constant 3 : i32
      %66 = arith.index_cast %arg4 : i32 to index
      %67 = arith.index_cast %c3_i32 : i32 to index
      %68 = memref.load %arg0[%66, %67] : memref<6x8xf32, #tpu.memory_space<smem>>
      %69 = vector.broadcast %68 : f32 to vector<1x128xf32>
      %70 = arith.mulf %69, %65 : vector<1x128xf32>
      %71 = arith.index_cast %arg4 : i32 to index
      %72 = arith.index_cast %c3_i32 : i32 to index
      %73 = memref.load %arg1[%71, %72] : memref<6x8xf32, #tpu.memory_space<smem>>
      %74 = vector.broadcast %73 : f32 to vector<1x128xf32>
      %75 = arith.addf %70, %74 : vector<1x128xf32>
      %76 = arith.mulf %7, %65 : vector<1x128xf32>
      %77 = arith.mulf %65, %3 : vector<1x128xf32>
      %78 = arith.addf %77, %5 : vector<1x128xf32>
      %79 = math.tanh %78 : vector<1x128xf32>
      %80 = arith.mulf %76, %79 : vector<1x128xf32>
      %81 = arith.subf %75, %80 : vector<1x128xf32>
      %c4_i32 = arith.constant 4 : i32
      %82 = arith.index_cast %arg4 : i32 to index
      %83 = arith.index_cast %c4_i32 : i32 to index
      %84 = memref.load %arg0[%82, %83] : memref<6x8xf32, #tpu.memory_space<smem>>
      %85 = vector.broadcast %84 : f32 to vector<1x128xf32>
      %86 = arith.mulf %85, %81 : vector<1x128xf32>
      %87 = arith.index_cast %arg4 : i32 to index
      %88 = arith.index_cast %c4_i32 : i32 to index
      %89 = memref.load %arg1[%87, %88] : memref<6x8xf32, #tpu.memory_space<smem>>
      %90 = vector.broadcast %89 : f32 to vector<1x128xf32>
      %91 = arith.addf %86, %90 : vector<1x128xf32>
      %92 = arith.mulf %7, %81 : vector<1x128xf32>
      %93 = arith.mulf %81, %3 : vector<1x128xf32>
      %94 = arith.addf %93, %5 : vector<1x128xf32>
      %95 = math.tanh %94 : vector<1x128xf32>
      %96 = arith.mulf %92, %95 : vector<1x128xf32>
      %97 = arith.subf %91, %96 : vector<1x128xf32>
      %c5_i32_7 = arith.constant 5 : i32
      %98 = arith.index_cast %arg4 : i32 to index
      %99 = arith.index_cast %c5_i32_7 : i32 to index
      %100 = memref.load %arg0[%98, %99] : memref<6x8xf32, #tpu.memory_space<smem>>
      %101 = vector.broadcast %100 : f32 to vector<1x128xf32>
      %102 = arith.mulf %101, %97 : vector<1x128xf32>
      %103 = arith.index_cast %arg4 : i32 to index
      %104 = arith.index_cast %c5_i32_7 : i32 to index
      %105 = memref.load %arg1[%103, %104] : memref<6x8xf32, #tpu.memory_space<smem>>
      %106 = vector.broadcast %105 : f32 to vector<1x128xf32>
      %107 = arith.addf %102, %106 : vector<1x128xf32>
      %108 = arith.mulf %7, %97 : vector<1x128xf32>
      %109 = arith.mulf %97, %3 : vector<1x128xf32>
      %110 = arith.addf %109, %5 : vector<1x128xf32>
      %111 = math.tanh %110 : vector<1x128xf32>
      %112 = arith.mulf %108, %111 : vector<1x128xf32>
      %113 = arith.subf %107, %112 : vector<1x128xf32>
      %c6_i32 = arith.constant 6 : i32
      %114 = arith.index_cast %arg4 : i32 to index
      %115 = arith.index_cast %c6_i32 : i32 to index
      %116 = memref.load %arg0[%114, %115] : memref<6x8xf32, #tpu.memory_space<smem>>
      %117 = vector.broadcast %116 : f32 to vector<1x128xf32>
      %118 = arith.mulf %117, %113 : vector<1x128xf32>
      %119 = arith.index_cast %arg4 : i32 to index
      %120 = arith.index_cast %c6_i32 : i32 to index
      %121 = memref.load %arg1[%119, %120] : memref<6x8xf32, #tpu.memory_space<smem>>
      %122 = vector.broadcast %121 : f32 to vector<1x128xf32>
      %123 = arith.addf %118, %122 : vector<1x128xf32>
      %124 = arith.mulf %7, %113 : vector<1x128xf32>
      %125 = arith.mulf %113, %3 : vector<1x128xf32>
      %126 = arith.addf %125, %5 : vector<1x128xf32>
      %127 = math.tanh %126 : vector<1x128xf32>
      %128 = arith.mulf %124, %127 : vector<1x128xf32>
      %129 = arith.subf %123, %128 : vector<1x128xf32>
      %c7_i32 = arith.constant 7 : i32
      %130 = arith.mulf %129, %3 : vector<1x128xf32>
      %131 = arith.addf %130, %5 : vector<1x128xf32>
      %132 = math.tanh %131 : vector<1x128xf32>
      %133 = arith.mulf %7, %132 : vector<1x128xf32>
      %134 = arith.addf %133, %7 : vector<1x128xf32>
      %135 = arith.index_cast %arg4 : i32 to index
      %c7 = arith.constant 7 : index
      %136 = memref.load %arg0[%135, %c7] : memref<6x8xf32, #tpu.memory_space<smem>>
      %137 = arith.mulf %7, %132 : vector<1x128xf32>
      %138 = vector.broadcast %136 : f32 to vector<1x128xf32>
      %139 = arith.subf %138, %137 : vector<1x128xf32>
      %cst_8 = arith.constant 1.000000e+00 : f32
      %140 = vector.broadcast %cst_8 : f32 to vector<1x128xf32>
      %141 = arith.subf %140, %134 : vector<1x128xf32>
      %142 = arith.subf %141, %139 : vector<1x128xf32>
      %143 = arith.mulf %134, %129 : vector<1x128xf32>
      %144 = arith.mulf %142, %129 : vector<1x128xf32>
      %c0_i32_9 = arith.constant 0 : i32
      %145 = vector.broadcast %c0_i32_9 : i32 to vector<1x128xi32>
      %146 = arith.cmpi eq, %8, %145 : vector<1x128xi32>
      %147 = arith.select %146, %143, %14 : vector<1x128xi1>, vector<1x128xf32>
      %c1_i32_10 = arith.constant 1 : i32
      %148 = vector.broadcast %c1_i32_10 : i32 to vector<1x128xi32>
      %149 = arith.cmpi eq, %8, %148 : vector<1x128xi32>
      %150 = arith.select %149, %129, %147 : vector<1x128xi1>, vector<1x128xf32>
      %c2_i32_11 = arith.constant 2 : i32
      %151 = vector.broadcast %c2_i32_11 : i32 to vector<1x128xi32>
      %152 = arith.cmpi eq, %8, %151 : vector<1x128xi32>
      %153 = arith.select %152, %144, %150 : vector<1x128xi1>, vector<1x128xf32>
      %c5_i32_12 = arith.constant 5 : i32
      %154 = vector.broadcast %c5_i32_12 : i32 to vector<1x128xi32>
      %155 = arith.cmpi eq, %8, %154 : vector<1x128xi32>
      %156 = arith.select %155, %134, %153 : vector<1x128xi1>, vector<1x128xf32>
      %c6_i32_13 = arith.constant 6 : i32
      %157 = vector.broadcast %c6_i32_13 : i32 to vector<1x128xi32>
      %158 = arith.cmpi eq, %8, %157 : vector<1x128xi32>
      %159 = arith.select %158, %142, %156 : vector<1x128xi1>, vector<1x128xf32>
      %c7_i32_14 = arith.constant 7 : i32
      %160 = vector.broadcast %c7_i32_14 : i32 to vector<1x128xi32>
      %161 = arith.cmpi eq, %8, %160 : vector<1x128xi32>
      %162 = arith.select %161, %139, %159 : vector<1x128xi1>, vector<1x128xf32>
      %163 = arith.index_cast %arg4 : i32 to index
      %c0_15 = arith.constant 0 : index
      %164 = vector.load %arg3[%163, %c0_15] : memref<6x128xf32, #tpu.memory_space<vmem>>, vector<1x128xf32>
      tpu.vector_store %arg3[%163, %c0_15], %162 {strides = array<i32>} : memref<6x128xf32, #tpu.memory_space<vmem>>, vector<1x128xf32>,
      %165 = arith.mulf %139, %129 : vector<1x128xf32>
      %166 = arith.index_cast %arg4 : i32 to index
      %c7_16 = arith.constant 7 : index
      %167 = memref.load %arg1[%166, %c7_16] : memref<6x8xf32, #tpu.memory_space<smem>>
      %168 = vector.broadcast %167 : f32 to vector<1x128xf32>
      %169 = arith.addf %165, %168 : vector<1x128xf32>
      scf.yield %169 : vector<1x128xf32>
    }
    %c5_i32_5 = arith.constant 5 : i32
    return
  }
}

</mosaic_0001>

<bundles_post_ra>
// kernel: tpu_custom_call.1
= control target key start
LH: loop header
LB: loop body
LE: loop exit
PB: predicated region body
PF: predicated region fallthrough
CT: control target
= control target key end

     0   :  { %8 = vsyncpa [#allocation4], 0  ;;  %s468_s0 = inlined_call_operand.hbm [shape: f32[6,8], index: 0, kind: input, shape index: {}]   ;;  %s469_s1 = inlined_call_operand.hbm [shape: f32[6,8], index: 1, kind: input, shape index: {}]   ;;  %s470_s2 = inlined_call_operand.vmem [shape: f32[4], index: 2, kind: input, shape index: {}]   ;;  %s471_s3 = inlined_call_operand.hbm [shape: f32[6,128], index: 3, kind: output, shape index: {}]  }
   0x1   :  { %9 = vsyncpa [#allocation7], 0 }
   0x2   :  { %10 = vsyncpa [#allocation5], 0 }
   0x3   :  { %11 = vsyncpa [#allocation3], 0  ;;  %s257_s14 = scalar_lea.hbm %s468_s0, 128 }
   0x4   :  { %p258_p0 = scmp.ne.s32.totalorder %s468_s0, %s257_s14  ;;  %p261_p1 = scmp.lt.u32.totalorder %s257_s14, %s468_s0 }
   0x6   :  { %p263_p2 = pnand %p261_p1, %p258_p0 }
   0x8   :  { %266 = shalt.err (!%p263_p2)
}
   0x9   :  { %s335_s19 = smov [#allocation2]   ;;  %s267_s24 = scalar_lea.hbm %s469_s1, 128 }
   0xa   :  { %19 = dma.hbm_to_smem %s468_s0, 128, %s335_s19, [#allocation4]  }
   0xb   :  { %p268_p3 = scmp.ne.s32.totalorder %s469_s1, %s267_s24  ;;  %p271_p4 = scmp.lt.u32.totalorder %s267_s24, %s469_s1 }
   0xd   :  { %p273_p5 = pnand %p271_p4, %p268_p3 }
   0xf   :  { %276 = shalt.err (!%p273_p5)
}
  0x10   :  { %s336_s29 = smov [#allocation6]   ;;  %s34_s6 = sshll.u32 %s470_s2, 4  ;;  %s35_s6 = int_to_ptr.vmem [resolvable:$true] %s34_s6 }
  0x11   :  { %27 = dma.hbm_to_smem %s469_s1, 128, %s336_s29, [#allocation7]  }
  0x12   :  { %s277_s7 = scalar_lea.vmem %s35_s6, 16  ;;  %p282_p7 = scmp.lt.s32.totalorder %s35_s6, %s35_s6 }
  0x13   :  { %p278_p6 = scmp.ne.s32.totalorder %s35_s6, %s277_s7  ;;  %p283_p8 = scmp.lt.s32.totalorder %s277_s7, %s277_s7 }
  0x15   :  { %p284_p9 = por %p283_p8, %p282_p7 }
  0x17   :  { %p285_p10 = pnand %p284_p9, %p278_p6 }
  0x19   :  { %288 = shalt.err (!%p285_p10)
}
  0x1a   :  { %s337_s8 = smov [#allocation8]  }
  0x1b   :  { %37 = dma.vmem_to_smem %s35_s6, 16, %s337_s8, [#allocation5]  }
  0x1c   :  { %319 = dma.done.wait [#allocation4], 128  }
  0x1d   :  { %320 = vsyncadd [#allocation4], 4294967168 }
  0x1e   :  { %321 = dma.done.wait [#allocation7], 128  }
  0x1f   :  { %322 = vsyncadd [#allocation7], 4294967168 }
  0x20   :  { %323 = dma.done.wait [#allocation5], 16  }
  0x21   :  { %324 = vsyncadd [#allocation5], 4294967280 }
  0x22   :  { %47 = sfence }
  0x23   :  { %s49_s1 = sld [smem:[#allocation8]]  ;;  %s216_s9 = sld [smem:[#allocation8 + $0x1]]  ;;  %v55_v0 = vlaneseq  ;;  %v338_v1 = vmov 0.0   ;;  %v398_v8 = vmov 0.0  }
  0x24   :  { %48 = vst [vmem:[#allocation9] sm:$0x3f] %v338_v1  ;;  %s217_s2 = sld [smem:[#allocation8 + $0x2]]  ;;  %s218_s10 = sld [smem:[#allocation8 + $0x3]] }
  0x25   :  { %v387_v2 = vand.u32 127, %v55_v0  ;;  %s400_s11 = smov 1  }
  0x27   :  { %vm57_vm0 = vcmp.eq.s32.totalorder %v387_v2, 8 }
  0x29   :  { %v390_v3 = vstv %s49_s1  ;;  %v392_v4 = vstv %s216_s9 }
  0x2a   :  { %v394_v5 = vstv %s217_s2  ;;  %v59_v6 = vstv %s218_s10 }
  0x2b   :  { %v396_v7 = vsel %vm57_vm0, %v59_v6, 0.0 }
  0x2c LB: > { %s407_s12 = sshll.u32 %s333_s11, 7  ;;  %v76_v9 = vmul.f32 %v329_v8, %v390_v3  ;;  %v75_v14 = vmul.f32 %v329_v8, %v394_v5  ;;  %vm172_vm1 = vcmp.eq.s32.totalorder %v387_v2, 0  ;;  %vm174_vm2 = vcmp.eq.s32.totalorder %v387_v2, 1  ;;  %s184_s8 = scalar_lea.vmem [#allocation9], %s333_s11  ;;  %s333_s11 = sphi %s400_s11, %s66_s11   ;;  %v329_v8 = vphi %v398_v8, %v189_v8  }
  0x2d   : > { %s69_s13 = sld [smem:[#allocation2 + %s407_s12]]  ;;  %s81_s15 = sadd.s32 1, %s407_s12  ;;  %vm176_vm3 = vcmp.eq.s32.totalorder %v387_v2, 2  ;;  %vm178_vm4 = vcmp.eq.s32.totalorder %v387_v2, 5  ;;  %vm180_vm5 = vcmp.eq.s32.totalorder %v387_v2, 6  ;;  %vm182_vm6 = vcmp.eq.s32.totalorder %v387_v2, 7 }
  0x2e   : > { %s72_s14 = sld [smem:[#allocation6 + %s407_s12]]  ;;  %v77_v10 = vadd.f32 %v76_v9, %v392_v4  ;;  %s94_s18 = sadd.s32 2, %s407_s12 }
  0x2f   : > { %s82_s16 = sld [smem:[#allocation2 + %s81_s15]]  ;;  %s107_s21 = sadd.s32 3, %s407_s12 }
  0x30   : > { %241 = vtanh.f32 %v77_v10  ;;  %s85_s17 = sld [smem:[#allocation6 + %s81_s15]]  ;;  %s120_s24 = sadd.s32 4, %s407_s12 }
  0x31   : > { %s95_s19 = sld [smem:[#allocation2 + %s94_s18]]  ;;  %s133_s27 = sadd.s32 5, %s407_s12 }
  0x32   : > { %s98_s20 = sld [smem:[#allocation6 + %s94_s18]]  ;;  %s146_s30 = sadd.s32 6, %s407_s12 }
  0x33   : > { %v70_v11 = vstv %s69_s13  ;;  %s108_s22 = sld [smem:[#allocation2 + %s107_s21]]  ;;  %s164_s5 = sadd.s32 7, %s407_s12 }
  0x34   : > { %v71_v12 = vmul.f32 %v329_v8, %v70_v11  ;;  %v73_v13 = vstv %s72_s14  ;;  %s111_s23 = sld [smem:[#allocation6 + %s107_s21]]  ;;  %s66_s11 = sadd.s32 1, %s333_s11  }
  0x35   : > { %v83_v21 = vstv %s82_s16  ;;  %s121_s25 = sld [smem:[#allocation2 + %s120_s24]]  ;;  %p63_p11 = scmp.ge.s32.totalorder %s66_s11, 6  }
  0x36   : > { %v74_v15 = vadd.f32 %v73_v13, %v71_v12  ;;  %v86_v23 = vstv %s85_s17  ;;  %s124_s26 = sld [smem:[#allocation6 + %s120_s24]]  ;;  %s339_s1 = smov (%p63_p11), [#allocation9]  }
  0x37   : > { %v96_v31 = vstv %s95_s19  ;;  %s134_s28 = sld [smem:[#allocation2 + %s133_s27]]  ;;  %s196_s9 = sshll.u32 (%p63_p11), %s339_s1, 4  ;;  %s197_s9 = int_to_ptr.vmem [resolvable:$true] %s196_s9 }
  0x38   : > { %v99_v33 = vstv %s98_s20  ;;  %s137_s29 = sld [smem:[#allocation6 + %s133_s27]]  ;;  %s289_s2 = scalar_lea.vmem (%p63_p11), %s197_s9, 128 }
  0x39   : > { %v109_v41 = vstv %s108_s22  ;;  %s147_s4 = sld [smem:[#allocation2 + %s146_s30]]  ;;  %p290_p12 = scmp.ne.s32.totalorder (%p63_p11), %s197_s9, %s289_s2 }
  0x3a   : > { %v242_v16 = vpop.eup %241  ;;  %v112_v43 = vstv %s111_s23  ;;  %s150_s0 = sld [smem:[#allocation6 + %s146_s30]]  ;;  %p294_p13 = scmp.lt.s32.totalorder (%p63_p11), %s197_s9, %s197_s9 }
  0x3b   : > { %v79_v17 = vmul.f32 %v242_v16, %v75_v14  ;;  %v122_v51 = vstv %s121_s25  ;;  %s165_s6 = sld [smem:[#allocation2 + %s164_s5]]  ;;  %p295_p0 = scmp.lt.s32.totalorder (%p63_p11), %s289_s2, %s289_s2 }
  0x3c   : > { %v125_v53 = vstv %s124_s26  ;;  %s187_s7 = sld [smem:[#allocation6 + %s164_s5]] }
  0x3d   : > { %v80_v18 = vsub.f32 %v74_v15, %v79_v17  ;;  %v135_v61 = vstv %s134_s28  ;;  %p296_p1 = por (%p63_p11), %p295_p0, %p294_p13 }
  0x3e   : > { %v138_v63 = vstv %s137_s29 }
  0x3f   : > { %v89_v19 = vmul.f32 %v80_v18, %v390_v3  ;;  %v84_v22 = vmul.f32 %v83_v21, %v80_v18  ;;  %v88_v24 = vmul.f32 %v80_v18, %v394_v5  ;;  %v148_v12 = vstv %s147_s4  ;;  %p297_p2 = pnand (%p63_p11), %p296_p1, %p290_p12 }
  0x40   : > { %v151_v14 = vstv %s150_s0 }
  0x41   : > { %v90_v20 = vadd.f32 %v89_v19, %v392_v4  ;;  %v87_v25 = vadd.f32 %v86_v23, %v84_v22  ;;  %v166_v23 = vstv %s165_s6 }
  0x43   : > { %243 = vtanh.f32 %v90_v20 }
  0x4d   : > { %v244_v26 = vpop.eup %243 }
  0x4e   : > { %v92_v27 = vmul.f32 %v244_v26, %v88_v24 }
  0x50   : > { %v93_v28 = vsub.f32 %v87_v25, %v92_v27  ;;  %v188_v27 = vstv %s187_s7 }
  0x52   : > { %v102_v29 = vmul.f32 %v93_v28, %v390_v3  ;;  %v97_v32 = vmul.f32 %v96_v31, %v93_v28  ;;  %v101_v34 = vmul.f32 %v93_v28, %v394_v5 }
  0x54   : > { %v103_v30 = vadd.f32 %v102_v29, %v392_v4  ;;  %v100_v35 = vadd.f32 %v99_v33, %v97_v32 }
  0x56   : > { %245 = vtanh.f32 %v103_v30 }
  0x60   : > { %v246_v36 = vpop.eup %245 }
  0x61   : > { %v105_v37 = vmul.f32 %v246_v36, %v101_v34 }
  0x63   : > { %v106_v38 = vsub.f32 %v100_v35, %v105_v37 }
  0x65   : > { %v115_v39 = vmul.f32 %v106_v38, %v390_v3  ;;  %v110_v42 = vmul.f32 %v109_v41, %v106_v38  ;;  %v114_v44 = vmul.f32 %v106_v38, %v394_v5 }
  0x67   : > { %v116_v40 = vadd.f32 %v115_v39, %v392_v4  ;;  %v113_v45 = vadd.f32 %v112_v43, %v110_v42 }
  0x69   : > { %247 = vtanh.f32 %v116_v40 }
  0x73   : > { %v248_v46 = vpop.eup %247 }
  0x74   : > { %v118_v47 = vmul.f32 %v248_v46, %v114_v44 }
  0x76   : > { %v119_v48 = vsub.f32 %v113_v45, %v118_v47 }
  0x78   : > { %v128_v49 = vmul.f32 %v119_v48, %v390_v3  ;;  %v123_v52 = vmul.f32 %v122_v51, %v119_v48  ;;  %v127_v54 = vmul.f32 %v119_v48, %v394_v5 }
  0x7a   : > { %v129_v50 = vadd.f32 %v128_v49, %v392_v4  ;;  %v126_v55 = vadd.f32 %v125_v53, %v123_v52 }
  0x7c   : > { %249 = vtanh.f32 %v129_v50 }
  0x86   : > { %v250_v56 = vpop.eup %249 }
  0x87   : > { %v131_v57 = vmul.f32 %v250_v56, %v127_v54 }
  0x89   : > { %v132_v58 = vsub.f32 %v126_v55, %v131_v57 }
  0x8b   : > { %v141_v59 = vmul.f32 %v132_v58, %v390_v3  ;;  %v136_v62 = vmul.f32 %v135_v61, %v132_v58  ;;  %v140_v0 = vmul.f32 %v132_v58, %v394_v5 }
  0x8d   : > { %v142_v60 = vadd.f32 %v141_v59, %v392_v4  ;;  %v139_v1 = vadd.f32 %v138_v63, %v136_v62 }
  0x8f   : > { %251 = vtanh.f32 %v142_v60 }
  0x99   : > { %v252_v6 = vpop.eup %251 }
  0x9a   : > { %v144_v8 = vmul.f32 %v252_v6, %v140_v0 }
  0x9c   : > { %v145_v9 = vsub.f32 %v139_v1, %v144_v8 }
  0x9e   : > { %v154_v10 = vmul.f32 %v145_v9, %v390_v3  ;;  %v149_v13 = vmul.f32 %v148_v12, %v145_v9  ;;  %v153_v15 = vmul.f32 %v145_v9, %v394_v5 }
  0xa0   : > { %v155_v11 = vadd.f32 %v154_v10, %v392_v4  ;;  %v152_v16 = vadd.f32 %v151_v14, %v149_v13 }
  0xa2   : > { %253 = vtanh.f32 %v155_v11 }
  0xac   : > { %v254_v17 = vpop.eup %253 }
  0xad   : > { %v157_v18 = vmul.f32 %v254_v17, %v153_v15 }
  0xaf   : > { %v158_v19 = vsub.f32 %v152_v16, %v157_v18 }
  0xb1   : > { %v159_v20 = vmul.f32 %v158_v19, %v390_v3 }
  0xb3   : > { %v160_v21 = vadd.f32 %v159_v20, %v392_v4 }
  0xb5   : > { %255 = vtanh.f32 %v160_v21 }
  0xbf   : > { %v256_v22 = vpop.eup %255 }
  0xc0   : > { %v162_v24 = vmul.f32 %v256_v22, %v394_v5 }
  0xc2   : > { %v163_v25 = vadd.f32 %v162_v24, %v394_v5  ;;  %v167_v26 = vsub.f32 %v166_v23, %v162_v24 }
  0xc4   : > { %v168_v28 = vsub.f32 1.0, %v163_v25  ;;  %v170_v29 = vmul.f32 %v163_v25, %v158_v19  ;;  %v186_v30 = vmul.f32 %v167_v26, %v158_v19 }
  0xc6   : > { %v169_v31 = vsub.f32 %v168_v28, %v167_v26  ;;  %v173_v32 = vsel %vm172_vm1, %v170_v29, %v396_v7  ;;  %v189_v8 = vadd.f32 %v188_v27, %v186_v30  }
  0xc7   : > { %v175_v33 = vsel %vm174_vm2, %v158_v19, %v173_v32 }
  0xc8   : > { %v171_v34 = vmul.f32 %v169_v31, %v158_v19  ;;  %65 = sbr.rel (!%p63_p11) target bundleno = 44 (0x2c), region = 52 }
  0xca   : > { %v177_v35 = vsel %vm176_vm3, %v171_v34, %v175_v33 }
  0xcb   : > { %v179_v36 = vsel %vm178_vm4, %v163_v25, %v177_v35 }
  0xcc   : > { %v181_v37 = vsel %vm180_vm5, %v169_v31, %v179_v36 }
  0xcd   : > { %v183_v38 = vsel %vm182_vm6, %v167_v26, %v181_v37 }
  0xce   : > { %185 = vst [vmem:[%s184_s8] sm:$0x1] %v183_v38 }
  0xcf   :  { %300 = shalt.err (!%p297_p2)
}
  0xd0   :  { %s301_s13 = scalar_lea.hbm %s471_s3, 128 }
  0xd1   :  { %p302_p3 = scmp.ne.s32.totalorder %s471_s3, %s301_s13  ;;  %p305_p4 = scmp.lt.u32.totalorder %s301_s13, %s471_s3 }
  0xd3   :  { %p307_p5 = pnand %p305_p4, %p302_p3 }
  0xd5   :  { %310 = shalt.err (!%p307_p5)
}
  0xd6   :  { %199 = dma.vmem_to_hbm [thread:$0]  %s197_s9, 128, %s471_s3, [#allocation3]  }
  0xd7   :  { %325 = dma.done.wait [#allocation3], 128  }
  0xd8   :  { %326 = vsyncadd [#allocation3], 4294967168 }
  0xd9   :  { %203 = vsyncpa [#allocation3], 1 }
  0xda   :  { %204 = vsyncpa [#allocation4], 1 }
  0xdb   :  { %205 = vsyncpa [#allocation7], 1 }
  0xdc   :  { %206 = vsyncpa [#allocation5], 1 }

</bundles_post_ra>
